<compile_context>
chip_gen: v7x
topology: tpu7x:2x2x1
jax: 0.10.0
libtpu: 0.0.40
codegen_flags: <defaults>
</compile_context>

<pallas_src>
import jax
import jax.numpy as jnp
from jax.experimental import pallas as pl
from jax.experimental.pallas import tpu as pltpu


def ae_classifier_kernel(x_ref, we_ref, be_ref, w1_ref, b1_ref, w2_ref, b2_ref, o_ref):
    """One batch tile, batch on lanes.

    x_ref : VMEM (4, TILE_B)      o_ref : VMEM (3, TILE_B)
    Weights/biases in SMEM, PyTorch (out_features, in_features) layout:
      we_ref (3, 4)  be_ref (3,)   w1_ref (3, 3)  b1_ref (3,)
      w2_ref (3, 3)  b2_ref (3,)
    """
    # Four lane-dense feature rows, each (1, TILE_B).
    xs = [x_ref[k:k + 1, :] for k in range(4)]

    def linear(rows, w_ref, b_ref, in_f, relu):
        out = []
        for j in range(3):                       # out_features == 3, fully unrolled
            acc = rows[0] * w_ref[j, 0]          # scalar (SMEM) * lane row (VPU)
            for k in range(1, in_f):
                acc = acc + rows[k] * w_ref[j, k]
            acc = acc + b_ref[j]
            if relu:
                acc = jnp.maximum(acc, 0.0)
            out.append(acc)
        return out

    h = linear(xs, we_ref, be_ref, 4, relu=True)    # encoder: Linear(4,3)+ReLU
    h = linear(h, w1_ref, b1_ref, 3, relu=True)     # fc1:     Linear(3,3)+ReLU
    z = linear(h, w2_ref, b2_ref, 3, relu=False)    # fc2:     Linear(3,3)

    # Softmax over the 3 class rows: purely elementwise across lanes (VPU/EUP).
    m = jnp.maximum(jnp.maximum(z[0], z[1]), z[2])
    e = [jnp.exp(zj - m) for zj in z]
    inv = pl.reciprocal(e[0] + e[1] + e[2], approx=True)   # EUP vrcp
    o_ref[...] = jnp.concatenate([ej * inv for ej in e], axis=0).astype(o_ref.dtype)


def ae_classifier_forward(x, params, tile_b=512):
    """x: (B, 4) float32 (PyTorch layout). Returns (B, 3) softmax probabilities."""
    B = x.shape[0]
    # Lane tile: multiple of 128, at least 128, at most tile_b; shrink for tiny B.
    tile_b = max(128, min(tile_b, pl.cdiv(B, 128) * 128))
    grid = pl.cdiv(B, tile_b)
    b_pad = grid * tile_b

    # Layout glue: batch -> lanes; zero-pad the tail tile (discarded below).
    x_t = jnp.zeros((4, b_pad), jnp.float32).at[:, :B].set(x.astype(jnp.float32).T)

    smem = pl.BlockSpec(memory_space=pltpu.MemorySpace.SMEM)
    out = pl.pallas_call(
        ae_classifier_kernel,
        out_shape=jax.ShapeDtypeStruct((3, b_pad), jnp.float32),
        grid=(grid,),
        in_specs=[
            pl.BlockSpec((4, tile_b), lambda i: (0, i)),   # x tile (VMEM, pipelined)
            smem, smem, smem, smem, smem, smem,            # weights/biases (SMEM, whole)
        ],
        out_specs=pl.BlockSpec((3, tile_b), lambda i: (0, i)),
        compiler_params=pltpu.CompilerParams(
            dimension_semantics=("parallel",),
        ),
    )(x_t,
      params["enc_w"], params["enc_b"],
      params["fc1_w"], params["fc1_b"],
      params["fc2_w"], params["fc2_b"])

    return out[:, :B].T


def init_params(key):
    """Deterministic init mimicking PyTorch nn.Linear default U(-1/sqrt(in), 1/sqrt(in))."""
    def linear(k, out_f, in_f):
        kw, kb = jax.random.split(k)
        bound = 1.0 / jnp.sqrt(in_f)
        w = jax.random.uniform(kw, (out_f, in_f), jnp.float32, -bound, bound)
        b = jax.random.uniform(kb, (out_f,), jnp.float32, -bound, bound)
        return w, b

    k_enc, k_fc1, k_fc2 = jax.random.split(key, 3)
    enc_w, enc_b = linear(k_enc, 3, 4)   # Encoder.fc1: Linear(4, 3)
    fc1_w, fc1_b = linear(k_fc1, 3, 3)   # AEClassifier.fc1: Linear(3, 3)
    fc2_w, fc2_b = linear(k_fc2, 3, 3)   # AEClassifier.fc2: Linear(3, 3)
    # The Decoder (Linear(3,4)) is not used in AEClassifier.forward -> not in hot path.
    return {
        "enc_w": enc_w, "enc_b": enc_b,
        "fc1_w": fc1_w, "fc1_b": fc1_b,
        "fc2_w": fc2_w, "fc2_b": fc2_b,
    }


def reference_forward(x, p):
    h = jnp.maximum(x @ p["enc_w"].T + p["enc_b"], 0.0)
    h = jnp.maximum(h @ p["fc1_w"].T + p["fc1_b"], 0.0)
    z = h @ p["fc2_w"].T + p["fc2_b"]
    return jax.nn.softmax(z, axis=1)


if __name__ == "__main__":
    key = jax.random.PRNGKey(0)
    k_x, k_p = jax.random.split(key)
    params = init_params(k_p)

    # Small batch (single padded tile) + a batch not divisible by the tile
    # (exercises multi-step grid + tail padding).
    for B in (8, 777):
        xb = jax.random.normal(jax.random.fold_in(k_x, B), (B, 4), jnp.float32)
        out = jax.block_until_ready(ae_classifier_forward(xb, params))
        ref = reference_forward(xb, params)
        assert out.shape == (B, 3)
        # Tolerance 5e-3: softmax epilogue uses the approximate EUP reciprocal.
        assert jnp.allclose(out, ref, atol=5e-3, rtol=5e-3)
        assert jnp.allclose(jnp.sum(out, axis=1), jnp.ones((B,)), atol=5e-3)

    print("KERNEL_OK")
</pallas_src>

<mosaic_0001>
module attributes {stable_mosaic.version = 11 : i64} {
  func.func @ae_classifier_kernel(%arg0: i32, %arg1: memref<4x128xf32, #tpu.memory_space<vmem>>, %arg2: memref<3x4xf32, #tpu.memory_space<smem>>, %arg3: memref<3xf32, #tpu.memory_space<smem>>, %arg4: memref<3x3xf32, #tpu.memory_space<smem>>, %arg5: memref<3xf32, #tpu.memory_space<smem>>, %arg6: memref<3x3xf32, #tpu.memory_space<smem>>, %arg7: memref<3xf32, #tpu.memory_space<smem>>, %arg8: memref<3x128xf32, #tpu.memory_space<vmem>>) attributes {dimension_semantics = [#tpu.dimension_semantics<parallel>], iteration_bounds = array<i64: 1>, scalar_prefetch = 0 : i64, scratch_operands = 0 : i64, tpu.core_type = #tpu.core_type<tc>, window_params = [{transform_indices = @transform_0, window_bounds = array<i64: 4, 128>}, {transform_indices = @transform_1, window_bounds = array<i64: 3, 4>}, {transform_indices = @transform_2, window_bounds = array<i64: 3>}, {transform_indices = @transform_3, window_bounds = array<i64: 3, 3>}, {transform_indices = @transform_4, window_bounds = array<i64: 3>}, {transform_indices = @transform_5, window_bounds = array<i64: 3, 3>}, {transform_indices = @transform_6, window_bounds = array<i64: 3>}, {transform_indices = @transform_7, window_bounds = array<i64: 3, 128>}]} {
    %c0 = arith.constant 0 : index
    %c0_0 = arith.constant 0 : index
    %0 = vector.load %arg1[%c0, %c0_0] : memref<4x128xf32, #tpu.memory_space<vmem>>, vector<1x128xf32>
    %c1 = arith.constant 1 : index
    %c0_1 = arith.constant 0 : index
    %1 = vector.load %arg1[%c1, %c0_1] : memref<4x128xf32, #tpu.memory_space<vmem>>, vector<1x128xf32>
    %c2 = arith.constant 2 : index
    %c0_2 = arith.constant 0 : index
    %2 = vector.load %arg1[%c2, %c0_2] : memref<4x128xf32, #tpu.memory_space<vmem>>, vector<1x128xf32>
    %c3 = arith.constant 3 : index
    %c0_3 = arith.constant 0 : index
    %3 = vector.load %arg1[%c3, %c0_3] : memref<4x128xf32, #tpu.memory_space<vmem>>, vector<1x128xf32>
    %c0_4 = arith.constant 0 : index
    %c0_5 = arith.constant 0 : index
    %4 = memref.load %arg2[%c0_4, %c0_5] : memref<3x4xf32, #tpu.memory_space<smem>>
    %5 = vector.broadcast %4 : f32 to vector<1x128xf32>
    %6 = arith.mulf %0, %5 : vector<1x128xf32>
    %c0_6 = arith.constant 0 : index
    %c1_7 = arith.constant 1 : index
    %7 = memref.load %arg2[%c0_6, %c1_7] : memref<3x4xf32, #tpu.memory_space<smem>>
    %8 = vector.broadcast %7 : f32 to vector<1x128xf32>
    %9 = arith.mulf %1, %8 : vector<1x128xf32>
    %10 = arith.addf %6, %9 : vector<1x128xf32>
    %c0_8 = arith.constant 0 : index
    %c2_9 = arith.constant 2 : index
    %11 = memref.load %arg2[%c0_8, %c2_9] : memref<3x4xf32, #tpu.memory_space<smem>>
    %12 = vector.broadcast %11 : f32 to vector<1x128xf32>
    %13 = arith.mulf %2, %12 : vector<1x128xf32>
    %14 = arith.addf %10, %13 : vector<1x128xf32>
    %c0_10 = arith.constant 0 : index
    %c3_11 = arith.constant 3 : index
    %15 = memref.load %arg2[%c0_10, %c3_11] : memref<3x4xf32, #tpu.memory_space<smem>>
    %16 = vector.broadcast %15 : f32 to vector<1x128xf32>
    %17 = arith.mulf %3, %16 : vector<1x128xf32>
    %18 = arith.addf %14, %17 : vector<1x128xf32>
    %c0_12 = arith.constant 0 : index
    %19 = memref.load %arg3[%c0_12] : memref<3xf32, #tpu.memory_space<smem>>
    %20 = vector.broadcast %19 : f32 to vector<1x128xf32>
    %21 = arith.addf %18, %20 : vector<1x128xf32>
    %cst = arith.constant 0.000000e+00 : f32
    %22 = vector.broadcast %cst : f32 to vector<1x128xf32>
    %23 = arith.maximumf %21, %22 : vector<1x128xf32>
    %c1_13 = arith.constant 1 : index
    %c0_14 = arith.constant 0 : index
    %24 = memref.load %arg2[%c1_13, %c0_14] : memref<3x4xf32, #tpu.memory_space<smem>>
    %25 = vector.broadcast %24 : f32 to vector<1x128xf32>
    %26 = arith.mulf %0, %25 : vector<1x128xf32>
    %c1_15 = arith.constant 1 : index
    %c1_16 = arith.constant 1 : index
    %27 = memref.load %arg2[%c1_15, %c1_16] : memref<3x4xf32, #tpu.memory_space<smem>>
    %28 = vector.broadcast %27 : f32 to vector<1x128xf32>
    %29 = arith.mulf %1, %28 : vector<1x128xf32>
    %30 = arith.addf %26, %29 : vector<1x128xf32>
    %c1_17 = arith.constant 1 : index
    %c2_18 = arith.constant 2 : index
    %31 = memref.load %arg2[%c1_17, %c2_18] : memref<3x4xf32, #tpu.memory_space<smem>>
    %32 = vector.broadcast %31 : f32 to vector<1x128xf32>
    %33 = arith.mulf %2, %32 : vector<1x128xf32>
    %34 = arith.addf %30, %33 : vector<1x128xf32>
    %c1_19 = arith.constant 1 : index
    %c3_20 = arith.constant 3 : index
    %35 = memref.load %arg2[%c1_19, %c3_20] : memref<3x4xf32, #tpu.memory_space<smem>>
    %36 = vector.broadcast %35 : f32 to vector<1x128xf32>
    %37 = arith.mulf %3, %36 : vector<1x128xf32>
    %38 = arith.addf %34, %37 : vector<1x128xf32>
    %c1_21 = arith.constant 1 : index
    %39 = memref.load %arg3[%c1_21] : memref<3xf32, #tpu.memory_space<smem>>
    %40 = vector.broadcast %39 : f32 to vector<1x128xf32>
    %41 = arith.addf %38, %40 : vector<1x128xf32>
    %cst_22 = arith.constant 0.000000e+00 : f32
    %42 = vector.broadcast %cst_22 : f32 to vector<1x128xf32>
    %43 = arith.maximumf %41, %42 : vector<1x128xf32>
    %c2_23 = arith.constant 2 : index
    %c0_24 = arith.constant 0 : index
    %44 = memref.load %arg2[%c2_23, %c0_24] : memref<3x4xf32, #tpu.memory_space<smem>>
    %45 = vector.broadcast %44 : f32 to vector<1x128xf32>
    %46 = arith.mulf %0, %45 : vector<1x128xf32>
    %c2_25 = arith.constant 2 : index
    %c1_26 = arith.constant 1 : index
    %47 = memref.load %arg2[%c2_25, %c1_26] : memref<3x4xf32, #tpu.memory_space<smem>>
    %48 = vector.broadcast %47 : f32 to vector<1x128xf32>
    %49 = arith.mulf %1, %48 : vector<1x128xf32>
    %50 = arith.addf %46, %49 : vector<1x128xf32>
    %c2_27 = arith.constant 2 : index
    %c2_28 = arith.constant 2 : index
    %51 = memref.load %arg2[%c2_27, %c2_28] : memref<3x4xf32, #tpu.memory_space<smem>>
    %52 = vector.broadcast %51 : f32 to vector<1x128xf32>
    %53 = arith.mulf %2, %52 : vector<1x128xf32>
    %54 = arith.addf %50, %53 : vector<1x128xf32>
    %c2_29 = arith.constant 2 : index
    %c3_30 = arith.constant 3 : index
    %55 = memref.load %arg2[%c2_29, %c3_30] : memref<3x4xf32, #tpu.memory_space<smem>>
    %56 = vector.broadcast %55 : f32 to vector<1x128xf32>
    %57 = arith.mulf %3, %56 : vector<1x128xf32>
    %58 = arith.addf %54, %57 : vector<1x128xf32>
    %c2_31 = arith.constant 2 : index
    %59 = memref.load %arg3[%c2_31] : memref<3xf32, #tpu.memory_space<smem>>
    %60 = vector.broadcast %59 : f32 to vector<1x128xf32>
    %61 = arith.addf %58, %60 : vector<1x128xf32>
    %cst_32 = arith.constant 0.000000e+00 : f32
    %62 = vector.broadcast %cst_32 : f32 to vector<1x128xf32>
    %63 = arith.maximumf %61, %62 : vector<1x128xf32>
    %c0_33 = arith.constant 0 : index
    %c0_34 = arith.constant 0 : index
    %64 = memref.load %arg4[%c0_33, %c0_34] : memref<3x3xf32, #tpu.memory_space<smem>>
    %65 = vector.broadcast %64 : f32 to vector<1x128xf32>
    %66 = arith.mulf %23, %65 : vector<1x128xf32>
    %c0_35 = arith.constant 0 : index
    %c1_36 = arith.constant 1 : index
    %67 = memref.load %arg4[%c0_35, %c1_36] : memref<3x3xf32, #tpu.memory_space<smem>>
    %68 = vector.broadcast %67 : f32 to vector<1x128xf32>
    %69 = arith.mulf %43, %68 : vector<1x128xf32>
    %70 = arith.addf %66, %69 : vector<1x128xf32>
    %c0_37 = arith.constant 0 : index
    %c2_38 = arith.constant 2 : index
    %71 = memref.load %arg4[%c0_37, %c2_38] : memref<3x3xf32, #tpu.memory_space<smem>>
    %72 = vector.broadcast %71 : f32 to vector<1x128xf32>
    %73 = arith.mulf %63, %72 : vector<1x128xf32>
    %74 = arith.addf %70, %73 : vector<1x128xf32>
    %c0_39 = arith.constant 0 : index
    %75 = memref.load %arg5[%c0_39] : memref<3xf32, #tpu.memory_space<smem>>
    %76 = vector.broadcast %75 : f32 to vector<1x128xf32>
    %77 = arith.addf %74, %76 : vector<1x128xf32>
    %cst_40 = arith.constant 0.000000e+00 : f32
    %78 = vector.broadcast %cst_40 : f32 to vector<1x128xf32>
    %79 = arith.maximumf %77, %78 : vector<1x128xf32>
    %c1_41 = arith.constant 1 : index
    %c0_42 = arith.constant 0 : index
    %80 = memref.load %arg4[%c1_41, %c0_42] : memref<3x3xf32, #tpu.memory_space<smem>>
    %81 = vector.broadcast %80 : f32 to vector<1x128xf32>
    %82 = arith.mulf %23, %81 : vector<1x128xf32>
    %c1_43 = arith.constant 1 : index
    %c1_44 = arith.constant 1 : index
    %83 = memref.load %arg4[%c1_43, %c1_44] : memref<3x3xf32, #tpu.memory_space<smem>>
    %84 = vector.broadcast %83 : f32 to vector<1x128xf32>
    %85 = arith.mulf %43, %84 : vector<1x128xf32>
    %86 = arith.addf %82, %85 : vector<1x128xf32>
    %c1_45 = arith.constant 1 : index
    %c2_46 = arith.constant 2 : index
    %87 = memref.load %arg4[%c1_45, %c2_46] : memref<3x3xf32, #tpu.memory_space<smem>>
    %88 = vector.broadcast %87 : f32 to vector<1x128xf32>
    %89 = arith.mulf %63, %88 : vector<1x128xf32>
    %90 = arith.addf %86, %89 : vector<1x128xf32>
    %c1_47 = arith.constant 1 : index
    %91 = memref.load %arg5[%c1_47] : memref<3xf32, #tpu.memory_space<smem>>
    %92 = vector.broadcast %91 : f32 to vector<1x128xf32>
    %93 = arith.addf %90, %92 : vector<1x128xf32>
    %cst_48 = arith.constant 0.000000e+00 : f32
    %94 = vector.broadcast %cst_48 : f32 to vector<1x128xf32>
    %95 = arith.maximumf %93, %94 : vector<1x128xf32>
    %c2_49 = arith.constant 2 : index
    %c0_50 = arith.constant 0 : index
    %96 = memref.load %arg4[%c2_49, %c0_50] : memref<3x3xf32, #tpu.memory_space<smem>>
    %97 = vector.broadcast %96 : f32 to vector<1x128xf32>
    %98 = arith.mulf %23, %97 : vector<1x128xf32>
    %c2_51 = arith.constant 2 : index
    %c1_52 = arith.constant 1 : index
    %99 = memref.load %arg4[%c2_51, %c1_52] : memref<3x3xf32, #tpu.memory_space<smem>>
    %100 = vector.broadcast %99 : f32 to vector<1x128xf32>
    %101 = arith.mulf %43, %100 : vector<1x128xf32>
    %102 = arith.addf %98, %101 : vector<1x128xf32>
    %c2_53 = arith.constant 2 : index
    %c2_54 = arith.constant 2 : index
    %103 = memref.load %arg4[%c2_53, %c2_54] : memref<3x3xf32, #tpu.memory_space<smem>>
    %104 = vector.broadcast %103 : f32 to vector<1x128xf32>
    %105 = arith.mulf %63, %104 : vector<1x128xf32>
    %106 = arith.addf %102, %105 : vector<1x128xf32>
    %c2_55 = arith.constant 2 : index
    %107 = memref.load %arg5[%c2_55] : memref<3xf32, #tpu.memory_space<smem>>
    %108 = vector.broadcast %107 : f32 to vector<1x128xf32>
    %109 = arith.addf %106, %108 : vector<1x128xf32>
    %cst_56 = arith.constant 0.000000e+00 : f32
    %110 = vector.broadcast %cst_56 : f32 to vector<1x128xf32>
    %111 = arith.maximumf %109, %110 : vector<1x128xf32>
    %c0_57 = arith.constant 0 : index
    %c0_58 = arith.constant 0 : index
    %112 = memref.load %arg6[%c0_57, %c0_58] : memref<3x3xf32, #tpu.memory_space<smem>>
    %113 = vector.broadcast %112 : f32 to vector<1x128xf32>
    %114 = arith.mulf %79, %113 : vector<1x128xf32>
    %c0_59 = arith.constant 0 : index
    %c1_60 = arith.constant 1 : index
    %115 = memref.load %arg6[%c0_59, %c1_60] : memref<3x3xf32, #tpu.memory_space<smem>>
    %116 = vector.broadcast %115 : f32 to vector<1x128xf32>
    %117 = arith.mulf %95, %116 : vector<1x128xf32>
    %118 = arith.addf %114, %117 : vector<1x128xf32>
    %c0_61 = arith.constant 0 : index
    %c2_62 = arith.constant 2 : index
    %119 = memref.load %arg6[%c0_61, %c2_62] : memref<3x3xf32, #tpu.memory_space<smem>>
    %120 = vector.broadcast %119 : f32 to vector<1x128xf32>
    %121 = arith.mulf %111, %120 : vector<1x128xf32>
    %122 = arith.addf %118, %121 : vector<1x128xf32>
    %c0_63 = arith.constant 0 : index
    %123 = memref.load %arg7[%c0_63] : memref<3xf32, #tpu.memory_space<smem>>
    %124 = vector.broadcast %123 : f32 to vector<1x128xf32>
    %125 = arith.addf %122, %124 : vector<1x128xf32>
    %c1_64 = arith.constant 1 : index
    %c0_65 = arith.constant 0 : index
    %126 = memref.load %arg6[%c1_64, %c0_65] : memref<3x3xf32, #tpu.memory_space<smem>>
    %127 = vector.broadcast %126 : f32 to vector<1x128xf32>
    %128 = arith.mulf %79, %127 : vector<1x128xf32>
    %c1_66 = arith.constant 1 : index
    %c1_67 = arith.constant 1 : index
    %129 = memref.load %arg6[%c1_66, %c1_67] : memref<3x3xf32, #tpu.memory_space<smem>>
    %130 = vector.broadcast %129 : f32 to vector<1x128xf32>
    %131 = arith.mulf %95, %130 : vector<1x128xf32>
    %132 = arith.addf %128, %131 : vector<1x128xf32>
    %c1_68 = arith.constant 1 : index
    %c2_69 = arith.constant 2 : index
    %133 = memref.load %arg6[%c1_68, %c2_69] : memref<3x3xf32, #tpu.memory_space<smem>>
    %134 = vector.broadcast %133 : f32 to vector<1x128xf32>
    %135 = arith.mulf %111, %134 : vector<1x128xf32>
    %136 = arith.addf %132, %135 : vector<1x128xf32>
    %c1_70 = arith.constant 1 : index
    %137 = memref.load %arg7[%c1_70] : memref<3xf32, #tpu.memory_space<smem>>
    %138 = vector.broadcast %137 : f32 to vector<1x128xf32>
    %139 = arith.addf %136, %138 : vector<1x128xf32>
    %c2_71 = arith.constant 2 : index
    %c0_72 = arith.constant 0 : index
    %140 = memref.load %arg6[%c2_71, %c0_72] : memref<3x3xf32, #tpu.memory_space<smem>>
    %141 = vector.broadcast %140 : f32 to vector<1x128xf32>
    %142 = arith.mulf %79, %141 : vector<1x128xf32>
    %c2_73 = arith.constant 2 : index
    %c1_74 = arith.constant 1 : index
    %143 = memref.load %arg6[%c2_73, %c1_74] : memref<3x3xf32, #tpu.memory_space<smem>>
    %144 = vector.broadcast %143 : f32 to vector<1x128xf32>
    %145 = arith.mulf %95, %144 : vector<1x128xf32>
    %146 = arith.addf %142, %145 : vector<1x128xf32>
    %c2_75 = arith.constant 2 : index
    %c2_76 = arith.constant 2 : index
    %147 = memref.load %arg6[%c2_75, %c2_76] : memref<3x3xf32, #tpu.memory_space<smem>>
    %148 = vector.broadcast %147 : f32 to vector<1x128xf32>
    %149 = arith.mulf %111, %148 : vector<1x128xf32>
    %150 = arith.addf %146, %149 : vector<1x128xf32>
    %c2_77 = arith.constant 2 : index
    %151 = memref.load %arg7[%c2_77] : memref<3xf32, #tpu.memory_space<smem>>
    %152 = vector.broadcast %151 : f32 to vector<1x128xf32>
    %153 = arith.addf %150, %152 : vector<1x128xf32>
    %154 = arith.maximumf %125, %139 : vector<1x128xf32>
    %155 = arith.maximumf %154, %153 : vector<1x128xf32>
    %156 = arith.subf %125, %155 : vector<1x128xf32>
    %157 = math.exp %156 : vector<1x128xf32>
    %158 = arith.subf %139, %155 : vector<1x128xf32>
    %159 = math.exp %158 : vector<1x128xf32>
    %160 = arith.subf %153, %155 : vector<1x128xf32>
    %161 = math.exp %160 : vector<1x128xf32>
    %162 = arith.addf %157, %159 : vector<1x128xf32>
    %163 = arith.addf %162, %161 : vector<1x128xf32>
    %164 = tpu.reciprocal %163 {approx = true} : vector<1x128xf32> -> vector<1x128xf32>
    %165 = arith.mulf %157, %164 : vector<1x128xf32>
    %166 = arith.mulf %159, %164 : vector<1x128xf32>
    %167 = arith.mulf %161, %164 : vector<1x128xf32>
    %168 = tpu.concatenate %165, %166, %167 in 0 : vector<1x128xf32>, vector<1x128xf32>, vector<1x128xf32> -> vector<3x128xf32>
    %c0_78 = arith.constant 0 : index
    %c0_79 = arith.constant 0 : index
    %169 = vector.load %arg8[%c0_78, %c0_79] : memref<3x128xf32, #tpu.memory_space<vmem>>, vector<3x128xf32>
    tpu.vector_store %arg8[%c0_78, %c0_79], %168 {strides = array<i32>} : memref<3x128xf32, #tpu.memory_space<vmem>>, vector<3x128xf32>,
    return
  }
  func.func @transform_0(%arg0: i32) -> (i32, i32) {
    %c0_i32 = arith.constant 0 : i32
    %c0_i32_0 = arith.constant 0 : i32
    return %c0_i32, %arg0 : i32, i32
  }
  func.func @transform_1(%arg0: i32) -> (i32, i32) {
    %c0_i32 = arith.constant 0 : i32
    %c0_i32_0 = arith.constant 0 : i32
    %c0_i32_1 = arith.constant 0 : i32
    return %c0_i32, %c0_i32_0 : i32, i32
  }
  func.func @transform_2(%arg0: i32) -> i32 {
    %c0_i32 = arith.constant 0 : i32
    %c0_i32_0 = arith.constant 0 : i32
    return %c0_i32 : i32
  }
  func.func @transform_3(%arg0: i32) -> (i32, i32) {
    %c0_i32 = arith.constant 0 : i32
    %c0_i32_0 = arith.constant 0 : i32
    %c0_i32_1 = arith.constant 0 : i32
    return %c0_i32, %c0_i32_0 : i32, i32
  }
  func.func @transform_4(%arg0: i32) -> i32 {
    %c0_i32 = arith.constant 0 : i32
    %c0_i32_0 = arith.constant 0 : i32
    return %c0_i32 : i32
  }
  func.func @transform_5(%arg0: i32) -> (i32, i32) {
    %c0_i32 = arith.constant 0 : i32
    %c0_i32_0 = arith.constant 0 : i32
    %c0_i32_1 = arith.constant 0 : i32
    return %c0_i32, %c0_i32_0 : i32, i32
  }
  func.func @transform_6(%arg0: i32) -> i32 {
    %c0_i32 = arith.constant 0 : i32
    %c0_i32_0 = arith.constant 0 : i32
    return %c0_i32 : i32
  }
  func.func @transform_7(%arg0: i32) -> (i32, i32) {
    %c0_i32 = arith.constant 0 : i32
    %c0_i32_0 = arith.constant 0 : i32
    return %c0_i32, %arg0 : i32, i32
  }
}

</mosaic_0001>

<bundles_post_ra>
// kernel: tpu_custom_call.1
= control target key start
LH: loop header
LB: loop body
LE: loop exit
PB: predicated region body
PF: predicated region fallthrough
CT: control target
= control target key end

     0   :  { %12 = vsyncpa [#allocation3], 0  ;;  %s677_s0 = inlined_call_operand.hbm [shape: f32[4,128], index: 0, kind: input, shape index: {}]   ;;  %s678_s1 = inlined_call_operand.hbm [shape: f32[3,4], index: 1, kind: input, shape index: {}]   ;;  %s679_s2 = inlined_call_operand.vmem [shape: f32[3], index: 2, kind: input, shape index: {}]   ;;  %s680_s3 = inlined_call_operand.vmem [shape: f32[3,3], index: 3, kind: input, shape index: {}]   ;;  %s681_s4 = inlined_call_operand.vmem [shape: f32[3], index: 4, kind: input, shape index: {}]   ;;  %s682_s5 = inlined_call_operand.vmem [shape: f32[3,3], index: 5, kind: input, shape index: {}]   ;;  %s683_s6 = inlined_call_operand.vmem [shape: f32[3], index: 6, kind: input, shape index: {}]   ;;  %s684_s7 = inlined_call_operand.hbm [shape: f32[3,128], index: 7, kind: output, shape index: {}]  }
   0x1   :  { %13 = vsyncpa [#allocation5], 0 }
   0x2   :  { %14 = vsyncpa [#allocation6], 0 }
   0x3   :  { %15 = vsyncpa [#allocation10], 0 }
   0x4   :  { %16 = vsyncpa [#allocation13], 0  ;;  %s52_s26 = sshll.u32 %s680_s3, 4  ;;  %s53_s26 = int_to_ptr.vmem [resolvable:$true] %s52_s26 }
   0x5   :  { %17 = vsyncpa [#allocation4], 0  ;;  %s72_s29 = sshll.u32 %s682_s5, 4  ;;  %s352_s30 = scalar_lea.vmem %s53_s26, 64  ;;  %s73_s29 = int_to_ptr.vmem [resolvable:$true] %s72_s29 }
   0x6   :  { %p353_p0 = scmp.ne.s32.totalorder %s53_s26, %s352_s30  ;;  %p357_p1 = scmp.lt.s32.totalorder %s53_s26, %s53_s26 }
   0x7   :  { %p358_p2 = scmp.lt.s32.totalorder %s352_s30, %s352_s30 }
   0x9   :  { %p359_p3 = por %p358_p2, %p357_p1 }
   0xb   :  { %p360_p4 = pnand %p359_p3, %p353_p0 }
   0xd   :  { %363 = shalt.err (!%p360_p4)
}
   0xe   :  { %s478_s8 = smov [#allocation9]   ;;  %s364_s9 = scalar_lea.vmem %s73_s29, 64 }
   0xf   :  { %55 = dma.vmem_to_smem %s53_s26, 64, %s478_s8, [#allocation10]  }
  0x10   :  { %p365_p5 = scmp.ne.s32.totalorder %s73_s29, %s364_s9  ;;  %p369_p6 = scmp.lt.s32.totalorder %s73_s29, %s73_s29 }
  0x11   :  { %p370_p7 = scmp.lt.s32.totalorder %s364_s9, %s364_s9 }
  0x13   :  { %p371_p8 = por %p370_p7, %p369_p6 }
  0x15   :  { %p372_p9 = pnand %p371_p8, %p365_p5 }
  0x17   :  { %375 = shalt.err (!%p372_p9)
}
  0x18   :  { %s479_s3 = smov [#allocation12]   ;;  %s480_s5 = smov [#allocation2]  }
  0x19   :  { %75 = dma.vmem_to_smem %s73_s29, 64, %s479_s3, [#allocation13]  }
  0x1a   :  { %s24_s10 = sshll.u32 %s480_s5, 4  ;;  %s42_s13 = sshll.u32 %s679_s2, 4  ;;  %s25_s10 = int_to_ptr.vmem [resolvable:$true] %s24_s10  ;;  %s535_s13 = int_to_ptr.vmem [resolvable:$true] %s42_s13 }
  0x1b   :  { %s376_s16 = scalar_lea.hbm %s677_s0, 64 }
  0x1c   :  { %p377_p10 = scmp.ne.s32.totalorder %s677_s0, %s376_s16  ;;  %p380_p11 = scmp.lt.u32.totalorder %s376_s16, %s677_s0 }
  0x1e   :  { %p382_p12 = pnand %p380_p11, %p377_p10 }
  0x20   :  { %385 = shalt.err (!%p382_p12)
}
  0x21   :  { %s386_s21 = scalar_lea.vmem %s25_s10, 64  ;;  %p391_p0 = scmp.lt.s32.totalorder %s25_s10, %s25_s10 }
  0x22   :  { %p387_p13 = scmp.ne.s32.totalorder %s25_s10, %s386_s21  ;;  %p392_p1 = scmp.lt.s32.totalorder %s386_s21, %s386_s21 }
  0x24   :  { %p393_p2 = por %p392_p1, %p391_p0 }
  0x26   :  { %p394_p3 = pnand %p393_p2, %p387_p13 }
  0x28   :  { %397 = shalt.err (!%p394_p3)
}
  0x29   :  { %27 = dma.hbm_to_vmem [thread:$0]  %s677_s0, 64, %s25_s10, [#allocation3]  }
  0x2a   :  { %s398_s25 = scalar_lea.hbm %s678_s1, 64 }
  0x2b   :  { %p399_p4 = scmp.ne.s32.totalorder %s678_s1, %s398_s25  ;;  %p402_p5 = scmp.lt.u32.totalorder %s398_s25, %s678_s1 }
  0x2d   :  { %p404_p6 = pnand %p402_p5, %p399_p4 }
  0x2f   :  { %407 = shalt.err (!%p404_p6)
}
  0x30   :  { %s481_s30 = smov [#allocation7]   ;;  %s62_s5 = sshll.u32 %s681_s4, 4  ;;  %s63_s5 = int_to_ptr.vmem [resolvable:$true] %s62_s5 }
  0x31   :  { %35 = dma.hbm_to_smem %s678_s1, 64, %s481_s30, [#allocation5]  }
  0x32   :  { %s408_s10 = scalar_lea.vmem %s535_s13, 16  ;;  %p413_p8 = scmp.lt.s32.totalorder %s535_s13, %s535_s13 }
  0x33   :  { %p409_p7 = scmp.ne.s32.totalorder %s535_s13, %s408_s10  ;;  %p414_p9 = scmp.lt.s32.totalorder %s408_s10, %s408_s10 }
  0x35   :  { %p415_p10 = por %p414_p9, %p413_p8 }
  0x37   :  { %p416_p11 = pnand %p415_p10, %p409_p7 }
  0x39   :  { %419 = shalt.err (!%p416_p11)
}
  0x3a   :  { %s482_s11 = smov [#allocation8]   ;;  %s420_s12 = scalar_lea.vmem %s63_s5, 16 }
  0x3b   :  { %45 = dma.vmem_to_smem %s535_s13, 16, %s482_s11, [#allocation6]  }
  0x3c   :  { %p421_p12 = scmp.ne.s32.totalorder %s63_s5, %s420_s12  ;;  %p425_p13 = scmp.lt.s32.totalorder %s63_s5, %s63_s5 }
  0x3d   :  { %p426_p0 = scmp.lt.s32.totalorder %s420_s12, %s420_s12 }
  0x3f   :  { %p427_p1 = por %p426_p0, %p425_p13 }
  0x41   :  { %p428_p2 = pnand %p427_p1, %p421_p12 }
  0x43   :  { %431 = shalt.err (!%p428_p2)
}
  0x44   :  { %s483_s1 = smov [#allocation11]   ;;  %s82_s15 = sshll.u32 %s683_s6, 4  ;;  %s83_s15 = int_to_ptr.vmem [resolvable:$true] %s82_s15 }
  0x45   :  { %65 = dma.vmem_to_smem %s63_s5, 16, %s483_s1, [#allocation10]  }
  0x46   :  { %s432_s16 = scalar_lea.vmem %s83_s15, 16  ;;  %p437_p4 = scmp.lt.s32.totalorder %s83_s15, %s83_s15 }
  0x47   :  { %p433_p3 = scmp.ne.s32.totalorder %s83_s15, %s432_s16  ;;  %p438_p5 = scmp.lt.s32.totalorder %s432_s16, %s432_s16 }
  0x49   :  { %p439_p6 = por %p438_p5, %p437_p4 }
  0x4b   :  { %p440_p7 = pnand %p439_p6, %p433_p3 }
  0x4d   :  { %443 = shalt.err (!%p440_p7)
}
  0x4e   :  { %s484_s13 = smov [#allocation14]  }
  0x4f   :  { %85 = dma.vmem_to_smem %s83_s15, 16, %s484_s13, [#allocation13]  }
  0x50   :  { %466 = dma.done.wait [#allocation3], 64  }
  0x51   :  { %467 = vsyncadd [#allocation3], 4294967232 }
  0x52   :  { %468 = dma.done.wait [#allocation5], 64  }
  0x53   :  { %469 = vsyncadd [#allocation5], 4294967232 }
  0x54   :  { %470 = dma.done.wait [#allocation6], 16  }
  0x55   :  { %471 = vsyncadd [#allocation6], 4294967280 }
  0x56   :  { %472 = dma.done.wait [#allocation10], 80  }
  0x57   :  { %473 = vsyncadd [#allocation10], 4294967216 }
  0x58   :  { %474 = dma.done.wait [#allocation13], 80  }
  0x59   :  { %475 = vsyncadd [#allocation13], 4294967216 }
  0x5a   :  { %107 = sfence }
  0x5b   :  { %s112_s6 = sld [smem:[#allocation7]]  ;;  %s303_s17 = sld [smem:[#allocation7 + $0x1]]  ;;  %v108_v0 = vld [vmem:[#allocation2] sm:$0x1]  ;;  %v109_v1 = vld [vmem:[#allocation2 + $0x1] sm:$0x1] }
  0x5c   :  { %s304_s18 = sld [smem:[#allocation7 + $0x2]]  ;;  %s305_s19 = sld [smem:[#allocation7 + $0x3]]  ;;  %v110_v2 = vld [vmem:[#allocation2 + $0x2] sm:$0x1]  ;;  %v111_v3 = vld [vmem:[#allocation2 + $0x3] sm:$0x1] }
  0x5d   :  { %s572_s20 = sld [smem:[#allocation8]]  ;;  %s307_s2 = sld [smem:[#allocation7 + $0x81]]  ;;  %vm279_vm0 = vcmask 1040384   ;;  %vm281_vm1 = vcmask 1041408  }
  0x5e   :  { %s306_s21 = sld [smem:[#allocation7 + $0x80]]  ;;  %s308_s22 = sld [smem:[#allocation7 + $0x82]] }
  0x5f   :  { %s309_s23 = sld [smem:[#allocation7 + $0x83]]  ;;  %s574_s24 = sld [smem:[#allocation7 + $0x100]] }
  0x60   :  { %s576_s25 = sld [smem:[#allocation7 + $0x101]]  ;;  %s578_s26 = sld [smem:[#allocation7 + $0x102]] }
  0x61   :  { %v113_v4 = vstv %s112_s6  ;;  %v116_v5 = vstv %s303_s17  ;;  %s580_s27 = sld [smem:[#allocation7 + $0x103]]  ;;  %s582_s28 = sld [smem:[#allocation8 + $0x1]] }
  0x62   :  { %v114_v6 = vmul.f32 %v113_v4, %v108_v0  ;;  %v117_v7 = vmul.f32 %v116_v5, %v109_v1  ;;  %v120_v8 = vstv %s304_s18  ;;  %v124_v9 = vstv %s305_s19  ;;  %s584_s29 = sld [smem:[#allocation8 + $0x2]]  ;;  %s586_s30 = sld [smem:[#allocation9]] }
  0x63   :  { %v121_v10 = vmul.f32 %v120_v8, %v110_v2  ;;  %v125_v11 = vmul.f32 %v124_v9, %v111_v3  ;;  %v135_v15 = vstv %s307_s2  ;;  %s588_s8 = sld [smem:[#allocation9 + $0x80]]  ;;  %v128_v17 = vstv %s572_s20  ;;  %s591_s9 = sld [smem:[#allocation9 + $0x1]] }
  0x64   :  { %v132_v12 = vstv %s306_s21  ;;  %v118_v13 = vadd.f32 %v117_v7, %v114_v6  ;;  %v139_v16 = vstv %s308_s22  ;;  %v136_v18 = vmul.f32 %v135_v15, %v109_v1  ;;  %s595_s0 = sld [smem:[#allocation9 + $0x81]]  ;;  %s597_s3 = sld [smem:[#allocation9 + $0x100]] }
  0x65   :  { %v133_v14 = vmul.f32 %v132_v12, %v108_v0  ;;  %v140_v19 = vmul.f32 %v139_v16, %v110_v2  ;;  %v143_v20 = vstv %s309_s23  ;;  %v151_v23 = vstv %s574_s24  ;;  %s600_s5 = sld [smem:[#allocation9 + $0x2]]  ;;  %s602_s10 = sld [smem:[#allocation9 + $0x101]] }
  0x66   :  { %v122_v21 = vadd.f32 %v121_v10, %v118_v13  ;;  %v144_v22 = vmul.f32 %v143_v20, %v111_v3  ;;  %v154_v24 = vstv %s576_s25  ;;  %v152_v26 = vmul.f32 %v151_v23, %v108_v0  ;;  %s605_s11 = sld [smem:[#allocation9 + $0x82]]  ;;  %s612_s1 = sld [smem:[#allocation11]] }
  0x67   :  { %v137_v25 = vadd.f32 %v136_v18, %v133_v14  ;;  %v155_v27 = vmul.f32 %v154_v24, %v109_v1  ;;  %v158_v28 = vstv %s578_s26  ;;  %v162_v31 = vstv %s580_s27  ;;  %s607_s12 = sld [smem:[#allocation9 + $0x102]]  ;;  %s615_s4 = sld [smem:[#allocation11 + $0x1]] }
  0x68   :  { %v126_v29 = vadd.f32 %v125_v11, %v122_v21  ;;  %v159_v30 = vmul.f32 %v158_v28, %v110_v2  ;;  %v163_v34 = vmul.f32 %v162_v31, %v111_v3  ;;  %v147_v36 = vstv %s582_s28  ;;  %s618_s14 = sld [smem:[#allocation11 + $0x2]]  ;;  %s623_s15 = sld [smem:[#allocation12]] }
  0x69   :  { %v141_v32 = vadd.f32 %v140_v19, %v137_v25  ;;  %v156_v33 = vadd.f32 %v155_v27, %v152_v26  ;;  %v166_v40 = vstv %s584_s29  ;;  %v170_v41 = vstv %s586_s30  ;;  %s625_s16 = sld [smem:[#allocation12 + $0x1]]  ;;  %s627_s13 = sld [smem:[#allocation12 + $0x2]] }
  0x6a   :  { %v129_v35 = vadd.f32 %v128_v17, %v126_v29  ;;  %v185_v42 = vstv %s588_s8  ;;  %v200_v45 = vstv %s597_s3  ;;  %v173_v46 = vstv %s591_s9  ;;  %s629_s6 = sld [smem:[#allocation12 + $0x80]]  ;;  %s634_s17 = sld [smem:[#allocation12 + $0x81]] }
  0x6b   :  { %v145_v37 = vadd.f32 %v144_v22, %v141_v32  ;;  %v160_v38 = vadd.f32 %v159_v30, %v156_v33  ;;  %v188_v47 = vstv %s595_s0  ;;  %v203_v48 = vstv %s602_s10  ;;  %s636_s18 = sld [smem:[#allocation12 + $0x82]]  ;;  %s638_s19 = sld [smem:[#allocation12 + $0x100]] }
  0x6c   :  { %v130_v39 = vmax.f32 %v129_v35, 0.0  ;;  %v177_v53 = vstv %s600_s5  ;;  %v192_v54 = vstv %s605_s11  ;;  %s640_s20 = sld [smem:[#allocation12 + $0x101]]  ;;  %s642_s21 = sld [smem:[#allocation12 + $0x102]]  ;;  %v181_v1 = vstv %s612_s1 }
  0x6d   :  { %v148_v43 = vadd.f32 %v147_v36, %v145_v37  ;;  %v164_v44 = vadd.f32 %v163_v34, %v160_v38  ;;  %v207_v56 = vstv %s607_s12  ;;  %v196_v2 = vstv %s615_s4  ;;  %s648_s2 = sld [smem:[#allocation14]]  ;;  %s650_s22 = sld [smem:[#allocation14 + $0x1]] }
  0x6e   :  { %v171_v51 = vmul.f32 %v170_v41, %v130_v39  ;;  %v186_v52 = vmul.f32 %v185_v42, %v130_v39  ;;  %v201_v55 = vmul.f32 %v200_v45, %v130_v39  ;;  %v211_v7 = vstv %s618_s14  ;;  %s654_s23 = sld [smem:[#allocation14 + $0x2]]  ;;  %s485_s24 = smov [#allocation15]  }
  0x6f   :  { %v149_v49 = vmax.f32 %v148_v43, 0.0  ;;  %v167_v50 = vadd.f32 %v166_v40, %v164_v44  ;;  %v215_v9 = vstv %s623_s15  ;;  %v218_v12 = vstv %s625_s16  ;;  %s290_s25 = sshll.u32 %s485_s24, 4  ;;  %s291_s25 = int_to_ptr.vmem [resolvable:$true] %s290_s25 }
  0x70   :  { %v222_v13 = vstv %s627_s13  ;;  %v229_v15 = vstv %s629_s6  ;;  %v232_v16 = vstv %s634_s17  ;;  %s444_s26 = scalar_lea.vmem %s291_s25, 64  ;;  %p449_p9 = scmp.lt.s32.totalorder %s291_s25, %s291_s25 }
  0x71   :  { %v168_v57 = vmax.f32 %v167_v50, 0.0  ;;  %v174_v58 = vmul.f32 %v173_v46, %v149_v49  ;;  %v189_v59 = vmul.f32 %v188_v47, %v149_v49  ;;  %v204_v60 = vmul.f32 %v203_v48, %v149_v49  ;;  %p445_p8 = scmp.ne.s32.totalorder %s291_s25, %s444_s26  ;;  %p450_p10 = scmp.lt.s32.totalorder %s444_s26, %s444_s26 }
  0x72   :  { %v236_v17 = vstv %s636_s18  ;;  %v243_v20 = vstv %s638_s19  ;;  %v246_v21 = vstv %s640_s20  ;;  %v250_v23 = vstv %s642_s21 }
  0x73   :  { %v175_v61 = vadd.f32 %v174_v58, %v171_v51  ;;  %v178_v62 = vmul.f32 %v177_v53, %v168_v57  ;;  %v190_v63 = vadd.f32 %v189_v59, %v186_v52  ;;  %v193_v0 = vmul.f32 %v192_v54, %v168_v57  ;;  %p451_p11 = por %p450_p10, %p449_p9 }
  0x74   :  { %v205_v3 = vadd.f32 %v204_v60, %v201_v55  ;;  %v208_v4 = vmul.f32 %v207_v56, %v168_v57  ;;  %v226_v35 = vstv %s648_s2  ;;  %v240_v36 = vstv %s650_s22 }
  0x75   :  { %v179_v5 = vadd.f32 %v178_v62, %v175_v61  ;;  %v194_v6 = vadd.f32 %v193_v0, %v190_v63  ;;  %v254_v40 = vstv %s654_s23  ;;  %p452_p12 = pnand %p451_p11, %p445_p8 }
  0x76   :  { %v209_v8 = vadd.f32 %v208_v4, %v205_v3 }
  0x77   :  { %v182_v10 = vadd.f32 %v181_v1, %v179_v5  ;;  %v197_v11 = vadd.f32 %v196_v2, %v194_v6 }
  0x78   :  { %v212_v14 = vadd.f32 %v211_v7, %v209_v8 }
  0x79   :  { %v183_v18 = vmax.f32 %v182_v10, 0.0  ;;  %v198_v19 = vmax.f32 %v197_v11, 0.0 }
  0x7a   :  { %v213_v22 = vmax.f32 %v212_v14, 0.0 }
  0x7b   :  { %v216_v24 = vmul.f32 %v215_v9, %v183_v18  ;;  %v219_v25 = vmul.f32 %v218_v12, %v198_v19  ;;  %v230_v26 = vmul.f32 %v229_v15, %v183_v18  ;;  %v233_v27 = vmul.f32 %v232_v16, %v198_v19 }
  0x7c   :  { %v223_v28 = vmul.f32 %v222_v13, %v213_v22  ;;  %v237_v29 = vmul.f32 %v236_v17, %v213_v22  ;;  %v244_v30 = vmul.f32 %v243_v20, %v183_v18  ;;  %v247_v31 = vmul.f32 %v246_v21, %v198_v19 }
  0x7d   :  { %v220_v32 = vadd.f32 %v219_v25, %v216_v24  ;;  %v234_v33 = vadd.f32 %v233_v27, %v230_v26  ;;  %v251_v34 = vmul.f32 %v250_v23, %v213_v22 }
  0x7e   :  { %v248_v37 = vadd.f32 %v247_v31, %v244_v30 }
  0x7f   :  { %v224_v38 = vadd.f32 %v223_v28, %v220_v32  ;;  %v238_v39 = vadd.f32 %v237_v29, %v234_v33 }
  0x80   :  { %v252_v41 = vadd.f32 %v251_v34, %v248_v37 }
  0x81   :  { %v227_v42 = vadd.f32 %v226_v35, %v224_v38  ;;  %v241_v43 = vadd.f32 %v240_v36, %v238_v39 }
  0x82   :  { %v255_v44 = vadd.f32 %v254_v40, %v252_v41 }
  0x83   :  { %v256_v45 = vmax.f32 %v227_v42, %v241_v43 }
  0x85   :  { %v257_v46 = vmax.f32 %v256_v45, %v255_v44 }
  0x87   :  { %v258_v47 = vsub.f32 %v227_v42, %v257_v46  ;;  %v261_v48 = vsub.f32 %v241_v43, %v257_v46  ;;  %v264_v49 = vsub.f32 %v255_v44, %v257_v46 }
  0x89   :  { %v259_v50 = vmul.f32 1.442695, %v258_v47  ;;  %v262_v51 = vmul.f32 1.442695, %v261_v48  ;;  %v265_v52 = vmul.f32 1.442695, %v264_v49 }
  0x8b   :  { %344 = vpow2.f32 %v259_v50 }
  0x8c   :  { %346 = vpow2.f32 %v262_v51 }
  0x8d   :  { %348 = vpow2.f32 %v265_v52 }
  0x95   :  { %v345_v53 = vpop.eup %344 }
  0x96   :  { %v347_v54 = vpop.eup %346 }
  0x97   :  { %v349_v55 = vpop.eup %348  ;;  %v267_v56 = vadd.f32 %v347_v54, %v345_v53 }
  0x99   :  { %v268_v57 = vadd.f32 %v349_v55, %v267_v56 }
  0x9b   :  { %350 = vrcp.f32 %v268_v57 }
  0xa5   :  { %v351_v58 = vpop.eup %350 }
  0xa6   :  { %v270_v59 = vmul.f32 %v351_v58, %v345_v53  ;;  %v271_v60 = vmul.f32 %v351_v58, %v347_v54  ;;  %v272_v61 = vmul.f32 %v351_v58, %v349_v55 }
  0xa8   :  { %v274_v62 = vrot.slane %v271_v60, 7  ;;  %v277_v63 = vrot.slane %v272_v61, 6 }
  0xaa   :  { %v280_v0 = vsel %vm279_vm0, %v270_v59, %v274_v62 }
  0xab   :  { %v282_v1 = vsel %vm281_vm1, %v280_v0, %v277_v63 }
  0xac   :  { %283 = vst [vmem:[#allocation15] sm:$0x7] %v282_v1 }
  0xad   :  { %455 = shalt.err (!%p452_p12)
}
  0xae   :  { %s456_s29 = scalar_lea.hbm %s684_s7, 64 }
  0xaf   :  { %p457_p13 = scmp.ne.s32.totalorder %s684_s7, %s456_s29  ;;  %p460_p0 = scmp.lt.u32.totalorder %s456_s29, %s684_s7 }
  0xb1   :  { %p462_p1 = pnand %p460_p0, %p457_p13 }
  0xb3   :  { %465 = shalt.err (!%p462_p1)
}
  0xb4   :  { %293 = dma.vmem_to_hbm [thread:$0]  %s291_s25, 64, %s684_s7, [#allocation4]  }
  0xb5   :  { %476 = dma.done.wait [#allocation4], 64  }
  0xb6   :  { %477 = vsyncadd [#allocation4], 4294967232 }
  0xb7   :  { %297 = vsyncpa [#allocation3], 1 }
  0xb8   :  { %298 = vsyncpa [#allocation4], 1 }
  0xb9   :  { %299 = vsyncpa [#allocation5], 1 }
  0xba   :  { %300 = vsyncpa [#allocation6], 1 }
  0xbb   :  { %301 = vsyncpa [#allocation10], 1 }
  0xbc   :  { %302 = vsyncpa [#allocation13], 1 }

</bundles_post_ra>
